<compile_context>
chip_gen: v6e
topology: v6e:2x2x1
jax: 0.10.0
libtpu: 0.0.40
codegen_flags: <defaults>
</compile_context>

<pallas_src>
import functools

import jax
import jax.numpy as jnp
from jax.experimental import pallas as pl
from jax.experimental.pallas import tpu as pltpu

LANE = 128
SUBLANE = 8
_MIN_SPLIT_ROWS = 512     # split a single large tile in two above 2*this


def _round_up(n, m):
    return ((n + m - 1) // m) * m


def _choose_tile(batch, tile_b):
    """Pick (tile rows, padded batch): <=7 dead rows, >=2 tiles when large."""
    b8 = _round_up(max(batch, 1), SUBLANE)
    n = -(-b8 // tile_b)                         # number of batch tiles
    if n == 1 and b8 >= 2 * _MIN_SPLIT_ROWS:     # keep >=2 tiles so v7x can
        n = 2                                    # use both TensorCores
    tb = _round_up(-(-b8 // n), SUBLANE)
    return tb, n * tb


# ----------------------------------------------------------------------------
# Kernel: one batch tile (TILE_B rows), whole model fused.
# ----------------------------------------------------------------------------
def _transition_kernel(xa_ref, w1_ref, b1_ref, gamma_ref, beta_ref,
                       w2_ref, b2_ref, mu_ref, *,
                       h_real, max_norm, do_normalize, matmul_dtype,
                       eps=1e-5):
    # --- fc: Linear(D+A -> H_pad); concat was done once in the wrapper ------
    xa = xa_ref[...].astype(matmul_dtype)
    h = jnp.dot(xa, w1_ref[...], preferred_element_type=jnp.float32)
    h = h + b1_ref[...]                  # (TILE_B, H_pad) f32; pad lanes == 0

    # --- ln: LayerNorm over the REAL hidden width via fused moments ---------
    # Padded lanes of h are exactly zero, so both sums are exact (no mask).
    inv_h = 1.0 / float(h_real)
    mean = jnp.sum(h, axis=-1, keepdims=True) * inv_h
    meansq = jnp.sum(h * h, axis=-1, keepdims=True) * inv_h
    var = jnp.maximum(meansq - mean * mean, 0.0)
    hn = (h - mean) * jax.lax.rsqrt(var + eps)
    hn = hn * gamma_ref[...] + beta_ref[...]   # gamma/beta pads are 0

    # --- relu ----------------------------------------------------------------
    hr = jnp.maximum(hn, 0.0)

    # --- fc_mu: Linear(H_pad -> out_dim), real (unpadded) output width -------
    mu = jnp.dot(hr.astype(matmul_dtype), w2_ref[...],
                 preferred_element_type=jnp.float32)
    mu = mu + b2_ref[...]

    # --- optional max-norm renorm: one rsqrt + min + mul ----------------------
    if max_norm and do_normalize:
        sumsq = jnp.sum(mu * mu, axis=-1, keepdims=True)
        # sumsq == 0 -> rsqrt = inf -> min(inf, 1) = 1 -> mu unchanged (== 0)
        scale = jnp.minimum(float(max_norm) * jax.lax.rsqrt(sumsq), 1.0)
        mu = mu * scale

    mu_ref[...] = mu.astype(mu_ref.dtype)


# ----------------------------------------------------------------------------
# Parameter preparation (once, outside the hot path):
#   * zero-pad the hidden dim to a multiple of 128 lanes (MXU / lane-dense LN)
#   * weights in matmul dtype (bf16 default), biases / LN params in f32
#   * output dim left at its real width (no 4x-padded writeback)
# ----------------------------------------------------------------------------
def prepare_params(raw, *, matmul_dtype=jnp.bfloat16):
    w1, b1 = raw["w1"], raw["b1"]
    gamma, beta = raw["gamma"], raw["beta"]
    w2, b2 = raw["w2"], raw["b2"]

    _, hidden = w1.shape
    h_pad = _round_up(hidden, LANE)
    hp = h_pad - hidden
    return {
        "w1": jnp.pad(w1, ((0, 0), (0, hp))).astype(matmul_dtype),
        "b1": jnp.pad(b1, ((0, 0), (0, hp))).astype(jnp.float32),
        "gamma": jnp.pad(gamma, ((0, 0), (0, hp))).astype(jnp.float32),
        "beta": jnp.pad(beta, ((0, 0), (0, hp))).astype(jnp.float32),
        "w2": jnp.pad(w2, ((0, hp), (0, 0))).astype(matmul_dtype),
        "b2": b2.astype(jnp.float32),
        "h_real": hidden,
        "matmul_dtype": matmul_dtype,
    }


# ----------------------------------------------------------------------------
# Wrapper mirroring DeterministicTransitionModel.forward -> (mu, None)
# ----------------------------------------------------------------------------
def deterministic_transition_forward(x, action, prep, *, max_norm=None,
                                     normalize=True, tile_b=2048):
    x = x.astype(jnp.float32)
    action = action.astype(jnp.float32)
    # Concat once in the wrapper -> single lane-dense input stream.
    xa = jnp.concatenate([x, action], axis=1)
    B, K = xa.shape
    h_pad = prep["b1"].shape[1]
    out_dim = prep["b2"].shape[1]

    tb, b_pad = _choose_tile(B, tile_b)
    if b_pad != B:
        xa = jnp.pad(xa, ((0, b_pad - B), (0, 0)))
    grid = (b_pad // tb,)

    def param_spec(arr):
        return pl.BlockSpec(arr.shape, lambda i: (0, 0))   # VMEM-resident

    kernel = functools.partial(
        _transition_kernel,
        h_real=prep["h_real"],
        max_norm=max_norm,
        do_normalize=normalize,
        matmul_dtype=prep["matmul_dtype"],
    )

    weight_bytes = sum(int(prep[k].size) * prep[k].dtype.itemsize
                       for k in ("w1", "b1", "gamma", "beta", "w2", "b2"))
    cost = pl.CostEstimate(
        flops=2 * b_pad * K * h_pad + 2 * b_pad * h_pad * out_dim,
        transcendentals=2 * b_pad,
        bytes_accessed=4 * b_pad * (K + out_dim) + weight_bytes,
    )

    mu_pad = pl.pallas_call(
        kernel,
        out_shape=jax.ShapeDtypeStruct((b_pad, out_dim), jnp.float32),
        grid_spec=pltpu.PrefetchScalarGridSpec(
            num_scalar_prefetch=0,
            grid=grid,
            in_specs=[
                pl.BlockSpec((tb, K), lambda i: (i, 0)),     # activations
                param_spec(prep["w1"]), param_spec(prep["b1"]),
                param_spec(prep["gamma"]), param_spec(prep["beta"]),
                param_spec(prep["w2"]), param_spec(prep["b2"]),
            ],
            out_specs=pl.BlockSpec((tb, out_dim), lambda i: (i, 0)),
        ),
        compiler_params=pltpu.CompilerParams(
            dimension_semantics=("parallel",)),   # megacore sharding on v7x
        cost_estimate=cost,
    )(xa, prep["w1"], prep["b1"], prep["gamma"], prep["beta"],
      prep["w2"], prep["b2"])

    mu = mu_pad if b_pad == B else mu_pad[:B]
    sigma = None
    return mu, sigma


# ----------------------------------------------------------------------------
# PyTorch-Linear-like synthetic init (raw, unpadded, (in, out) layout)
# ----------------------------------------------------------------------------
def init_params(key, in_dim, action_dim, hidden_dim, out_dim):
    k1, k2, k3, k4 = jax.random.split(key, 4)
    fan_in1 = in_dim + action_dim
    lim1 = 1.0 / jnp.sqrt(fan_in1)
    lim2 = 1.0 / jnp.sqrt(hidden_dim)
    return {
        "w1": jax.random.uniform(k1, (fan_in1, hidden_dim), jnp.float32, -lim1, lim1),
        "b1": jax.random.uniform(k2, (1, hidden_dim), jnp.float32, -lim1, lim1),
        "gamma": jnp.ones((1, hidden_dim), jnp.float32),
        "beta": jnp.zeros((1, hidden_dim), jnp.float32),
        "w2": jax.random.uniform(k3, (hidden_dim, out_dim), jnp.float32, -lim2, lim2),
        "b2": jax.random.uniform(k4, (1, out_dim), jnp.float32, -lim2, lim2),
    }


def reference_forward(x, action, params, *, max_norm=None, normalize=True,
                      eps=1e-5):
    """Pure-JAX reference (mirrors the PyTorch module) for correctness."""
    xa = jnp.concatenate([x, action], axis=1)
    h = xa @ params["w1"] + params["b1"]
    mean = jnp.mean(h, axis=-1, keepdims=True)
    var = jnp.mean((h - mean) ** 2, axis=-1, keepdims=True)
    h = (h - mean) / jnp.sqrt(var + eps) * params["gamma"] + params["beta"]
    h = jnp.maximum(h, 0.0)
    mu = h @ params["w2"] + params["b2"]
    if max_norm and normalize:
        norms = jnp.linalg.norm(mu, axis=-1, keepdims=True)
        mu = mu / jnp.maximum(norms / max_norm, 1.0)
    return mu


if __name__ == "__main__":
    # Shapes consistent with the module: projection.out_dim=32, action=(4,),
    # hidden_dim=64, batch=8.  max_norm exercises the normalize branch.
    B, OUT_DIM, ACT_DIM, HIDDEN = 8, 32, 4, 64
    MAX_NORM = 1.0

    key = jax.random.PRNGKey(0)
    kx, ka, kp = jax.random.split(key, 3)
    x = jax.random.normal(kx, (B, OUT_DIM), jnp.float32)
    action = jax.random.normal(ka, (B, ACT_DIM), jnp.float32)
    raw = init_params(kp, OUT_DIM, ACT_DIM, HIDDEN, OUT_DIM)

    mu_ref = reference_forward(x, action, raw, max_norm=MAX_NORM, normalize=True)

    # f32 matmul path (parity check, tight tolerance).
    prep_f32 = prepare_params(raw, matmul_dtype=jnp.float32)
    mu_f32, sigma = deterministic_transition_forward(
        x, action, prep_f32, max_norm=MAX_NORM, normalize=True)
    mu_f32 = jax.block_until_ready(mu_f32)
    assert sigma is None
    assert mu_f32.shape == (B, OUT_DIM)
    assert jnp.allclose(mu_f32, mu_ref, atol=2e-4, rtol=2e-4), (
        float(jnp.max(jnp.abs(mu_f32 - mu_ref))))

    # bf16-operand / f32-accumulate path (performance default, loose tolerance).
    prep_bf16 = prepare_params(raw, matmul_dtype=jnp.bfloat16)
    mu_bf16, _ = deterministic_transition_forward(
        x, action, prep_bf16, max_norm=MAX_NORM, normalize=True)
    mu_bf16 = jax.block_until_ready(mu_bf16)
    assert mu_bf16.shape == (B, OUT_DIM)
    assert jnp.allclose(mu_bf16, mu_ref, atol=5e-2, rtol=5e-2), (
        float(jnp.max(jnp.abs(mu_bf16 - mu_ref))))

    # Single-tile path with batch rounding (B=300 -> tile 304, slice back).
    B2 = 300
    x2 = jax.random.normal(jax.random.PRNGKey(1), (B2, OUT_DIM), jnp.float32)
    a2 = jax.random.normal(jax.random.PRNGKey(2), (B2, ACT_DIM), jnp.float32)
    mu2, _ = deterministic_transition_forward(
        x2, a2, prep_f32, max_norm=MAX_NORM, normalize=True)
    mu2 = jax.block_until_ready(mu2)
    mu2_ref = reference_forward(x2, a2, raw, max_norm=MAX_NORM, normalize=True)
    assert mu2.shape == (B2, OUT_DIM)
    assert jnp.allclose(mu2, mu2_ref, atol=2e-4, rtol=2e-4), (
        float(jnp.max(jnp.abs(mu2 - mu2_ref))))

    # Multi-tile grid with an awkward batch (B=2500 -> 2 tiles of 1256 rows).
    B3 = 2500
    x3 = jax.random.normal(jax.random.PRNGKey(3), (B3, OUT_DIM), jnp.float32)
    a3 = jax.random.normal(jax.random.PRNGKey(4), (B3, ACT_DIM), jnp.float32)
    mu3, _ = deterministic_transition_forward(
        x3, a3, prep_f32, max_norm=MAX_NORM, normalize=True)
    mu3 = jax.block_until_ready(mu3)
    mu3_ref = reference_forward(x3, a3, raw, max_norm=MAX_NORM, normalize=True)
    assert mu3.shape == (B3, OUT_DIM)
    assert jnp.allclose(mu3, mu3_ref, atol=2e-4, rtol=2e-4), (
        float(jnp.max(jnp.abs(mu3 - mu3_ref))))

    print("KERNEL_OK")
</pallas_src>

<mosaic_0001>
module attributes {stable_mosaic.version = 11 : i64} {
  func.func @_transition_kernel(%arg0: i32, %arg1: memref<8x36xf32, #tpu.memory_space<vmem>>, %arg2: memref<36x128xf32, #tpu.memory_space<vmem>>, %arg3: memref<1x128xf32, #tpu.memory_space<vmem>>, %arg4: memref<1x128xf32, #tpu.memory_space<vmem>>, %arg5: memref<1x128xf32, #tpu.memory_space<vmem>>, %arg6: memref<128x32xf32, #tpu.memory_space<vmem>>, %arg7: memref<1x32xf32, #tpu.memory_space<vmem>>, %arg8: memref<8x32xf32, #tpu.memory_space<vmem>>) attributes {dimension_semantics = [#tpu.dimension_semantics<parallel>], iteration_bounds = array<i64: 1>, scalar_prefetch = 0 : i64, scratch_operands = 0 : i64, tpu.core_type = #tpu.core_type<tc>, window_params = [{transform_indices = @transform_0, window_bounds = array<i64: 8, 36>}, {pipeline_mode = #tpu.pipeline_mode<synchronous>, transform_indices = @transform_1, window_bounds = array<i64: 36, 128>}, {pipeline_mode = #tpu.pipeline_mode<synchronous>, transform_indices = @transform_2, window_bounds = array<i64: 1, 128>}, {pipeline_mode = #tpu.pipeline_mode<synchronous>, transform_indices = @transform_3, window_bounds = array<i64: 1, 128>}, {pipeline_mode = #tpu.pipeline_mode<synchronous>, transform_indices = @transform_4, window_bounds = array<i64: 1, 128>}, {pipeline_mode = #tpu.pipeline_mode<synchronous>, transform_indices = @transform_5, window_bounds = array<i64: 128, 32>}, {pipeline_mode = #tpu.pipeline_mode<synchronous>, transform_indices = @transform_6, window_bounds = array<i64: 1, 32>}, {transform_indices = @transform_7, window_bounds = array<i64: 8, 32>}]} {
    %c0 = arith.constant 0 : index
    %c0_0 = arith.constant 0 : index
    %0 = vector.load %arg1[%c0, %c0_0] : memref<8x36xf32, #tpu.memory_space<vmem>>, vector<8x36xf32>
    %c0_1 = arith.constant 0 : index
    %c0_2 = arith.constant 0 : index
    %1 = vector.load %arg2[%c0_1, %c0_2] : memref<36x128xf32, #tpu.memory_space<vmem>>, vector<36x128xf32>
    %cst = arith.constant dense<0.000000e+00> : vector<8x128xf32>
    %2 = tpu.matmul %0, %1, %cst {dimension_numbers = #tpu.dot_dimension_numbers<[1], [0], [0], [1], [0, 0, 1, 1], [], []>} : vector<8x36xf32>, vector<36x128xf32>, vector<8x128xf32> -> vector<8x128xf32>
    %c0_3 = arith.constant 0 : index
    %c0_4 = arith.constant 0 : index
    %3 = vector.load %arg3[%c0_3, %c0_4] : memref<1x128xf32, #tpu.memory_space<vmem>>, vector<1x128xf32>
    %4 = vector.broadcast %3 : vector<1x128xf32> to vector<8x128xf32>
    %5 = arith.addf %2, %4 : vector<8x128xf32>
    %cst_5 = arith.constant dense<0.000000e+00> : vector<8xf32>
    %6 = vector.multi_reduction <add>, %5, %cst_5 [1] : vector<8x128xf32> to vector<8xf32>
    %7 = vector.shape_cast %6 : vector<8xf32> to vector<8x1xf32>
    %cst_6 = arith.constant 1.562500e-02 : f32
    %8 = vector.broadcast %cst_6 : f32 to vector<8x1xf32>
    %9 = arith.mulf %7, %8 : vector<8x1xf32>
    %10 = arith.mulf %5, %5 : vector<8x128xf32>
    %cst_7 = arith.constant dense<0.000000e+00> : vector<8xf32>
    %11 = vector.multi_reduction <add>, %10, %cst_7 [1] : vector<8x128xf32> to vector<8xf32>
    %12 = vector.shape_cast %11 : vector<8xf32> to vector<8x1xf32>
    %cst_8 = arith.constant 1.562500e-02 : f32
    %13 = vector.broadcast %cst_8 : f32 to vector<8x1xf32>
    %14 = arith.mulf %12, %13 : vector<8x1xf32>
    %15 = arith.mulf %9, %9 : vector<8x1xf32>
    %16 = arith.subf %14, %15 : vector<8x1xf32>
    %cst_9 = arith.constant 0.000000e+00 : f32
    %17 = vector.broadcast %cst_9 : f32 to vector<8x1xf32>
    %18 = arith.maximumf %16, %17 : vector<8x1xf32>
    %19 = vector.broadcast %9 : vector<8x1xf32> to vector<8x128xf32>
    %20 = arith.subf %5, %19 : vector<8x128xf32>
    %cst_10 = arith.constant 9.99999974E-6 : f32
    %21 = vector.broadcast %cst_10 : f32 to vector<8x1xf32>
    %22 = arith.addf %18, %21 : vector<8x1xf32>
    %23 = math.rsqrt %22 : vector<8x1xf32>
    %24 = vector.broadcast %23 : vector<8x1xf32> to vector<8x128xf32>
    %25 = arith.mulf %20, %24 : vector<8x128xf32>
    %c0_11 = arith.constant 0 : index
    %c0_12 = arith.constant 0 : index
    %26 = vector.load %arg4[%c0_11, %c0_12] : memref<1x128xf32, #tpu.memory_space<vmem>>, vector<1x128xf32>
    %27 = vector.broadcast %26 : vector<1x128xf32> to vector<8x128xf32>
    %28 = arith.mulf %25, %27 : vector<8x128xf32>
    %c0_13 = arith.constant 0 : index
    %c0_14 = arith.constant 0 : index
    %29 = vector.load %arg5[%c0_13, %c0_14] : memref<1x128xf32, #tpu.memory_space<vmem>>, vector<1x128xf32>
    %30 = vector.broadcast %29 : vector<1x128xf32> to vector<8x128xf32>
    %31 = arith.addf %28, %30 : vector<8x128xf32>
    %cst_15 = arith.constant 0.000000e+00 : f32
    %32 = vector.broadcast %cst_15 : f32 to vector<8x128xf32>
    %33 = arith.maximumf %31, %32 : vector<8x128xf32>
    %c0_16 = arith.constant 0 : index
    %c0_17 = arith.constant 0 : index
    %34 = vector.load %arg6[%c0_16, %c0_17] : memref<128x32xf32, #tpu.memory_space<vmem>>, vector<128x32xf32>
    %cst_18 = arith.constant dense<0.000000e+00> : vector<8x32xf32>
    %35 = tpu.matmul %33, %34, %cst_18 {dimension_numbers = #tpu.dot_dimension_numbers<[1], [0], [0], [1], [0, 0, 1, 1], [], []>} : vector<8x128xf32>, vector<128x32xf32>, vector<8x32xf32> -> vector<8x32xf32>
    %c0_19 = arith.constant 0 : index
    %c0_20 = arith.constant 0 : index
    %36 = vector.load %arg7[%c0_19, %c0_20] : memref<1x32xf32, #tpu.memory_space<vmem>>, vector<1x32xf32>
    %37 = vector.broadcast %36 : vector<1x32xf32> to vector<8x32xf32>
    %38 = arith.addf %35, %37 : vector<8x32xf32>
    %39 = arith.mulf %38, %38 : vector<8x32xf32>
    %cst_21 = arith.constant dense<0.000000e+00> : vector<8xf32>
    %40 = vector.multi_reduction <add>, %39, %cst_21 [1] : vector<8x32xf32> to vector<8xf32>
    %41 = vector.shape_cast %40 : vector<8xf32> to vector<8x1xf32>
    %42 = math.rsqrt %41 : vector<8x1xf32>
    %cst_22 = arith.constant 1.000000e+00 : f32
    %43 = vector.broadcast %cst_22 : f32 to vector<8x1xf32>
    %44 = arith.mulf %43, %42 : vector<8x1xf32>
    %cst_23 = arith.constant 1.000000e+00 : f32
    %45 = vector.broadcast %cst_23 : f32 to vector<8x1xf32>
    %46 = arith.minimumf %44, %45 : vector<8x1xf32>
    %47 = vector.broadcast %46 : vector<8x1xf32> to vector<8x32xf32>
    %48 = arith.mulf %38, %47 : vector<8x32xf32>
    %c0_24 = arith.constant 0 : index
    %c0_25 = arith.constant 0 : index
    %49 = vector.load %arg8[%c0_24, %c0_25] : memref<8x32xf32, #tpu.memory_space<vmem>>, vector<8x32xf32>
    tpu.vector_store %arg8[%c0_24, %c0_25], %48 {strides = array<i32>} : memref<8x32xf32, #tpu.memory_space<vmem>>, vector<8x32xf32>,
    return
  }
  func.func @transform_0(%arg0: i32) -> (i32, i32) {
    %c0_i32 = arith.constant 0 : i32
    %c0_i32_0 = arith.constant 0 : i32
    return %arg0, %c0_i32 : i32, i32
  }
  func.func @transform_1(%arg0: i32) -> (i32, i32) {
    %c0_i32 = arith.constant 0 : i32
    %c0_i32_0 = arith.constant 0 : i32
    %c0_i32_1 = arith.constant 0 : i32
    return %c0_i32, %c0_i32_0 : i32, i32
  }
  func.func @transform_2(%arg0: i32) -> (i32, i32) {
    %c0_i32 = arith.constant 0 : i32
    %c0_i32_0 = arith.constant 0 : i32
    %c0_i32_1 = arith.constant 0 : i32
    return %c0_i32, %c0_i32_0 : i32, i32
  }
  func.func @transform_3(%arg0: i32) -> (i32, i32) {
    %c0_i32 = arith.constant 0 : i32
    %c0_i32_0 = arith.constant 0 : i32
    %c0_i32_1 = arith.constant 0 : i32
    return %c0_i32, %c0_i32_0 : i32, i32
  }
  func.func @transform_4(%arg0: i32) -> (i32, i32) {
    %c0_i32 = arith.constant 0 : i32
    %c0_i32_0 = arith.constant 0 : i32
    %c0_i32_1 = arith.constant 0 : i32
    return %c0_i32, %c0_i32_0 : i32, i32
  }
  func.func @transform_5(%arg0: i32) -> (i32, i32) {
    %c0_i32 = arith.constant 0 : i32
    %c0_i32_0 = arith.constant 0 : i32
    %c0_i32_1 = arith.constant 0 : i32
    return %c0_i32, %c0_i32_0 : i32, i32
  }
  func.func @transform_6(%arg0: i32) -> (i32, i32) {
    %c0_i32 = arith.constant 0 : i32
    %c0_i32_0 = arith.constant 0 : i32
    %c0_i32_1 = arith.constant 0 : i32
    return %c0_i32, %c0_i32_0 : i32, i32
  }
  func.func @transform_7(%arg0: i32) -> (i32, i32) {
    %c0_i32 = arith.constant 0 : i32
    %c0_i32_0 = arith.constant 0 : i32
    return %arg0, %c0_i32 : i32, i32
  }
}

</mosaic_0001>

<bundles_post_ra>
// kernel: tpu_custom_call.1
= control target key start
LH: loop header
LB: loop body
LE: loop exit
PB: predicated region body
PF: predicated region fallthrough
CT: control target
= control target key end

     0   :  { %vm44_vm0 = vcmask 1043456   ;;  %v371_v1 = vmov 0.0   ;;  %vm372_vm1 = vmmov 0   ;;  %s524_s0 = inlined_call_operand.vmem [shape: f32[8,36], index: 0, kind: input, shape index: {}]   ;;  %s525_s1 = inlined_call_operand.vmem [shape: f32[36,128], index: 1, kind: input, shape index: {}]   ;;  %s526_s2 = inlined_call_operand.vmem [shape: f32[1,128], index: 2, kind: input, shape index: {}]   ;;  %s527_s3 = inlined_call_operand.vmem [shape: f32[1,128], index: 3, kind: input, shape index: {}]   ;;  %s528_s4 = inlined_call_operand.vmem [shape: f32[1,128], index: 4, kind: input, shape index: {}]   ;;  %s529_s5 = inlined_call_operand.vmem [shape: f32[128,32], index: 5, kind: input, shape index: {}]   ;;  %s530_s6 = inlined_call_operand.vmem [shape: f32[1,32], index: 6, kind: input, shape index: {}]   ;;  %s531_s7 = inlined_call_operand.hbm [shape: f32[8,32], index: 7, kind: output, shape index: {}]  }
   0x1   :  { %v32_v0 = vld [vmem:[%s525_s1 + $0x20] sm:$0xf]  ;;  %294 = vmatprep.subr.mxu0 %v371_v1  ;;  %v31_v2 = vld [vmem:[%s525_s1 + $0x18] sm:$0xff]  ;;  %307 = vmatprep.subr.mxu1 %v371_v1 }
   0x2   :  { %295 = vmatpush3.msk.msra.mxu0 %vm44_vm0, %v32_v0  ;;  %304 = vmatprep.mubr.msk.f32.mxu0 %vm372_vm1, %v371_v1 }
   0x3   :  { %12 = vsyncpa [#allocation3], 0  ;;  %296 = vmatprep.subr.mxu0 %v371_v1  ;;  %v30_v3 = vld [vmem:[%s525_s1 + $0x10] sm:$0xff]  ;;  %339 = vmatprep.mubr.msk.f32.mxu1 %vm372_vm1, %v371_v1  ;;  %v29_v4 = vld [vmem:[%s525_s1 + $0x8] sm:$0xff]  ;;  %vm40_vm2 = vcmask 293888   ;;  %vm243_vm3 = vcmask 261120  }
   0x4   :  { %297 = vmatpush3.msra.mxu0 %v31_v2  ;;  %v28_v5 = vld [vmem:[%s525_s1] sm:$0xff]  ;;  %v164_v12 = vld [vmem:[%s529_s5 + $0x78] sm:$0xff]  ;;  %v163_v13 = vld [vmem:[%s529_s5 + $0x70] sm:$0xff] }
   0x5   :  { %298 = vmatprep.subr.mxu0 %v371_v1  ;;  %v27_v6 = vld [vmem:[%s524_s0] sm:$0xff]  ;;  %308 = vmatpush3.msra.mxu1 %v164_v12  ;;  %v162_v14 = vld [vmem:[%s529_s5 + $0x68] sm:$0xff]  ;;  %v160_v16 = vld [vmem:[%s529_s5 + $0x58] sm:$0xff] }
   0x6   :  { %299 = vmatpush3.msra.mxu0 %v30_v3  ;;  %v265_v7 = vld [vmem:[%s526_s2] ss:$0 sm:$0xff]  ;;  %309 = vmatprep.subr.mxu1 %v371_v1  ;;  %v159_v17 = vld [vmem:[%s529_s5 + $0x50] sm:$0xff]  ;;  %v158_v18 = vld [vmem:[%s529_s5 + $0x48] sm:$0xff] }
   0x7   :  { %300 = vmatprep.subr.mxu0 %v371_v1  ;;  %310 = vmatpush3.msra.mxu1 %v163_v13  ;;  %v161_v15 = vld [vmem:[%s529_s5 + $0x60] sm:$0xff]  ;;  %v156_v20 = vld [vmem:[%s529_s5 + $0x38] sm:$0xff]  ;;  %v155_v21 = vld [vmem:[%s529_s5 + $0x30] sm:$0xff] }
   0x8   :  { %301 = vmatpush3.msra.mxu0 %v29_v4  ;;  %311 = vmatprep.subr.mxu1 %v371_v1  ;;  %v157_v19 = vld [vmem:[%s529_s5 + $0x40] sm:$0xff]  ;;  %v154_v22 = vld [vmem:[%s529_s5 + $0x28] sm:$0xff]  ;;  %v152_v24 = vld [vmem:[%s529_s5 + $0x18] sm:$0xff] }
   0x9   :  { %302 = vmatprep.subr.mxu0 %v371_v1  ;;  %312 = vmatpush3.msra.mxu1 %v162_v14  ;;  %v153_v23 = vld [vmem:[%s529_s5 + $0x20] sm:$0xff]  ;;  %v151_v25 = vld [vmem:[%s529_s5 + $0x10] sm:$0xff]  ;;  %v150_v26 = vld [vmem:[%s529_s5 + $0x8] sm:$0xff] }
   0xa   :  { %303 = vmatpush3.msra.mxu0 %v28_v5  ;;  %313 = vmatprep.subr.mxu1 %v371_v1  ;;  %v149_v27 = vld [vmem:[%s529_s5] sm:$0xff] }
   0xb   :  { %305 = vmatmul.mubr.msk.f32.vlgmr.msra.gmra.mxu0 %vm40_vm2, %v27_v6  ;;  %314 = vmatpush3.msra.mxu1 %v161_v15  ;;  %v268_v38 = vld [vmem:[%s527_s3] ss:$0 sm:$0xff]  ;;  %s373_s3 = smov [#allocation2]  }
   0xc   :  { %315 = vmatprep.subr.mxu1 %v371_v1  ;;  %v269_v40 = vld [vmem:[%s528_s4] ss:$0 sm:$0xff]  ;;  %s257_s4 = sshll.u32 %s373_s3, 4  ;;  %s258_s4 = int_to_ptr.vmem [resolvable:$true] %s257_s4 }
   0xd   :  { %316 = vmatpush3.msra.mxu1 %v160_v16  ;;  %v270_v44 = vld [vmem:[%s530_s6] ss:$0 sm:$0xff]  ;;  %s349_s23 = scalar_lea.vmem %s258_s4, 128  ;;  %p354_p1 = scmp.lt.s32.totalorder %s258_s4, %s258_s4 }
   0xe   :  { %317 = vmatprep.subr.mxu1 %v371_v1  ;;  %p350_p0 = scmp.ne.s32.totalorder %s258_s4, %s349_s23  ;;  %p355_p2 = scmp.lt.s32.totalorder %s349_s23, %s349_s23 }
   0xf   :  { %318 = vmatpush3.msra.mxu1 %v159_v17 }
  0x10   :  { %319 = vmatprep.subr.mxu1 %v371_v1  ;;  %p356_p3 = por %p355_p2, %p354_p1 }
  0x11   :  { %320 = vmatpush3.msra.mxu1 %v158_v18 }
  0x12   :  { %321 = vmatprep.subr.mxu1 %v371_v1  ;;  %p357_p4 = pnand %p356_p3, %p350_p0 }
  0x13   :  { %322 = vmatpush3.msra.mxu1 %v157_v19 }
  0x14   :  { %323 = vmatprep.subr.mxu1 %v371_v1 }
  0x15   :  { %324 = vmatpush3.msra.mxu1 %v156_v20 }
  0x16   :  { %325 = vmatprep.subr.mxu1 %v371_v1 }
  0x17   :  { %326 = vmatpush3.msra.mxu1 %v155_v21 }
  0x18   :  { %327 = vmatprep.subr.mxu1 %v371_v1 }
  0x19   :  { %328 = vmatpush3.msra.mxu1 %v154_v22 }
  0x1a   :  { %329 = vmatprep.subr.mxu1 %v371_v1 }
  0x1b   :  { %330 = vmatpush3.msra.mxu1 %v153_v23 }
  0x1c   :  { %331 = vmatprep.subr.mxu1 %v371_v1 }
  0x1d   :  { %332 = vmatpush3.msra.mxu1 %v152_v24 }
  0x1e   :  { %333 = vmatprep.subr.mxu1 %v371_v1 }
  0x1f   :  { %334 = vmatpush3.msra.mxu1 %v151_v25 }
  0x20   :  { %335 = vmatprep.subr.mxu1 %v371_v1 }
  0x21   :  { %336 = vmatpush3.msra.mxu1 %v150_v26 }
  0x22   :  { %337 = vmatprep.subr.mxu1 %v371_v1 }
  0x23   :  { %338 = vmatpush3.msra.mxu1 %v149_v27 }
  0xcb   :  { %v114_v8 = vpop.f32.mrf.mxu0 }
  0xcc   :  { %v443_v9 = vadd.f32 %v265_v7, %v114_v8 }
  0xcd   :  { %v306_v10 = vpop.f32.mrf.mxu0 }
  0xce   :  { %118 = vadd.xlane.f32.xlu0 %v443_v9  ;;  %v121_v11 = vmul.f32 %v443_v9, %v443_v9 }
  0xd2   :  { %122 = vadd.xlane.f32.xlu0 %v121_v11 }
 0x157   :  { %v119_v28 = vpop.xlane.xlu0 %118 }
 0x158   :  { %v120_v29 = vmul.f32 0.015625, %v119_v28 }
 0x15a   :  { %v125_v31 = vmul.f32 %v120_v29, %v120_v29  ;;  %v128_v36 = vsub.f32 %v443_v9, %v120_v29 }
 0x15b   :  { %v123_v30 = vpop.xlane.xlu0 %122 }
 0x15c   :  { %v124_v32 = vmul.f32 0.015625, %v123_v30 }
 0x15e   :  { %v126_v33 = vsub.f32 %v124_v32, %v125_v31 }
 0x160   :  { %v127_v34 = vmax.f32 %v126_v33, 0.0 }
 0x162   :  { %v129_v35 = vadd.f32 1e-05, %v127_v34 }
 0x164   :  { %345 = vrsqrt.f32 %v129_v35 }
 0x171   :  { %v346_v37 = vpop.eup %345 }
 0x172   :  { %v131_v39 = vmul.f32 %v346_v37, %v128_v36 }
 0x174   :  { %v139_v41 = vmul.f32 %v268_v38, %v131_v39 }
 0x176   :  { %v147_v42 = vadd.f32 %v269_v40, %v139_v41 }
 0x178   :  { %v148_v43 = vmax.f32 %v147_v42, 0.0 }
 0x17a   :  { %340 = vmatmul.mubr.f32.vlgmr.msra.gmra.mxu1 %v148_v43 }
 0x23a   :  { %v238_v45 = vpop.f32.mrf.mxu1 }
 0x23b   :  { %v239_v46 = vadd.f32 %v270_v44, %v238_v45 }
 0x23c   :  { %v341_v47 = vpop.f32.mrf.mxu1 }
 0x23d   :  { %v242_v48 = vmul.f32 %v239_v46, %v239_v46 }
 0x23f   :  { %v244_v49 = vsel %vm243_vm3, %v242_v48, 0.0 }
 0x240   :  { %245 = vadd.xlane.f32.xlu1 %v244_v49 }
 0x2c9   :  { %v246_v50 = vpop.xlane.xlu1 %245 }
 0x2ca   :  { %347 = vrsqrt.f32 %v246_v50 }
 0x2d7   :  { %v348_v51 = vpop.eup %347 }
 0x2d8   :  { %v248_v52 = vmin.f32 %v348_v51, 1.0 }
 0x2da   :  { %v249_v53 = vmul.f32 %v248_v52, %v239_v46 }
 0x2dc   :  { %250 = vst.msk [vmem:[#allocation2] sm:$0xff] %vm243_vm3, %v249_v53 }
 0x2dd   :  { %360 = shalt.err (!%p357_p4)
}
 0x2de   :  { %260 = dma.vmem_to_hbm [thread:$0]  %s258_s4, 128, %s531_s7, [#allocation3]  }
 0x2df   :  { %369 = dma.done.wait [#allocation3], 128  }
 0x2e0   :  { %370 = vsyncadd [#allocation3], 4294967168 }
 0x2e1   :  { %264 = vsyncpa [#allocation3], 1 }

</bundles_post_ra>
